<compile_context>
chip_gen: v7x
topology: tpu7x:2x2x1
jax: 0.10.0
libtpu: 0.0.40
codegen_flags: <defaults>
</compile_context>

<pallas_src>
import jax
import jax.numpy as jnp
import numpy as np
from jax.experimental import pallas as pl
from jax.experimental.pallas import tpu as pltpu

# ---- problem sizes (small, consistent with the module) ----
B = 2            # batch
C_IN = 4         # image channels
H = W = 16       # spatial
K = 3            # conv kernel
CONV_OUT = 8     # conv channels
N_IMG_OUT = 64   # image feature dim
N_TAB = 5        # len(tabular_features)
HID1 = 256       # fc1
HID2 = 128       # fc2
N_OUT = 1        # out (bias=False)

HWP = H * W          # 256 patch rows per image
CKK = C_IN * K * K   # 36 patch columns

# layout of the "small" parameter pack, a single (64, 128) f32 buffer:
#   rows 0:36,  cols 0:8    -> wc  (conv weight, im2col layout)
#   row  36,    cols 0:8    -> bc  (conv bias)
#   rows 40:48, cols 0:64   -> wp  (8 -> 64 projection weight)
#   row  48,    cols 0:64   -> bp  (projection bias)
#   row  56,    cols 0:128  -> w3^T (final 128 -> 1 projection, stored as a row)
SMALL_ROWS = 64
SMALL_COLS = 128
WP_ROW = 40
BP_ROW = 48
W3_ROW = 56


# ----------------------------------------------------------------------------
# Fused kernel: conv-as-matmul + ReLU + mean-pool (MXU) + proj + ReLU + MLP head
# ----------------------------------------------------------------------------
def _fused_kernel(patches_ref, tab_ref, small_ref, w1p_ref, w2p_ref, o_ref):
    # patches_ref: (B*HWP, CKK)   tab_ref: (B, N_TAB)
    # small_ref:   (64, 128) parameter pack (see layout above)
    # w1p_ref:     (N_IMG_OUT + N_TAB + 1, HID1)  = [w1_img ; w1_tab ; b1]
    # w2p_ref:     (HID1 + 1, HID2)               = [w2 ; b2]
    # o_ref:       (B, N_OUT)
    small = small_ref[...]
    wc = small[0:CKK, 0:CONV_OUT]                       # (36, 8)
    bc = small[CKK:CKK + 1, 0:CONV_OUT]                 # (1, 8)
    wp = small[WP_ROW:WP_ROW + CONV_OUT, 0:N_IMG_OUT]   # (8, 64)
    bp = small[BP_ROW:BP_ROW + 1, 0:N_IMG_OUT]          # (1, 64)
    w3t = small[W3_ROW:W3_ROW + 1, 0:HID2]              # (1, 128)

    # --- conv (im2col form) over ALL images at once, + bias, ReLU ---
    s = jnp.dot(patches_ref[...], wc, preferred_element_type=jnp.float32) + bc
    s = jnp.maximum(s, 0.0)                             # (B*HWP, 8)

    # --- per-image global mean pool as an MXU matmul with a block-averaging matrix
    #     (keeps the 256-row reduction off the XLU on v6e/v7x) ---
    r = jax.lax.broadcasted_iota(jnp.int32, (B, B * HWP), 0)
    c = jax.lax.broadcasted_iota(jnp.int32, (B, B * HWP), 1)
    lo = r * HWP
    pool = jnp.where((c >= lo) & (c < lo + HWP),
                     jnp.float32(1.0 / HWP), jnp.float32(0.0))        # (B, B*HWP)
    pooled = jnp.dot(pool, s, preferred_element_type=jnp.float32)     # (B, 8)

    # --- 8 -> 64 projection + ReLU (image feature) ---
    feat = jnp.maximum(
        jnp.dot(pooled, wp, preferred_element_type=jnp.float32) + bp, 0.0)  # (B, 64)

    # --- fc1: concat([feat, tab]) @ W1 realized as split matmuls + bias row ---
    w1p = w1p_ref[...]
    w1_img = w1p[0:N_IMG_OUT, :]                                   # (64, 256)
    w1_tab = w1p[N_IMG_OUT:N_IMG_OUT + N_TAB, :]                   # (5, 256)
    b1 = w1p[N_IMG_OUT + N_TAB:N_IMG_OUT + N_TAB + 1, :]           # (1, 256)
    h1 = (jnp.dot(feat, w1_img, preferred_element_type=jnp.float32)
          + jnp.dot(tab_ref[...], w1_tab, preferred_element_type=jnp.float32)
          + b1)
    h1 = jnp.maximum(h1, 0.0)                                      # (B, 256)

    # --- fc2 + ReLU ---
    w2p = w2p_ref[...]
    h2 = jnp.maximum(
        jnp.dot(h1, w2p[0:HID1, :], preferred_element_type=jnp.float32)
        + w2p[HID1:HID1 + 1, :], 0.0)                              # (B, 128)

    # --- final 128 -> 1 projection on the VPU (avoid an N=1 MXU pass) ---
    o_ref[...] = jnp.sum(h2 * w3t, axis=1, keepdims=True)          # (B, 1)


# ----------------------------------------------------------------------------
# Glue: im2col (3x3, pad=1, stride=1) for NHWC images
# ----------------------------------------------------------------------------
def im2col_3x3(x_nhwc):
    b, h, w, c = x_nhwc.shape
    xp = jnp.pad(x_nhwc, ((0, 0), (1, 1), (1, 1), (0, 0)))
    cols = [xp[:, di:di + h, dj:dj + w, :] for di in range(K) for dj in range(K)]
    patches = jnp.stack(cols, axis=3)          # (B, H, W, K*K, C)
    return patches.reshape(b, h * w, K * K * c)


# ----------------------------------------------------------------------------
# Full forward (dropout = identity, eval semantics)
# ----------------------------------------------------------------------------
@jax.jit
def multimodal_forward(img_nchw, tab, packed):
    # layout: convert PyTorch NCHW -> NHWC for the conv path
    img_nhwc = jnp.transpose(img_nchw, (0, 2, 3, 1)).astype(jnp.float32)
    patches = im2col_3x3(img_nhwc).reshape(B * HWP, CKK)        # (512, 36)
    return pl.pallas_call(
        _fused_kernel,
        out_shape=jax.ShapeDtypeStruct((B, N_OUT), jnp.float32),
        in_specs=[pl.BlockSpec(memory_space=pltpu.MemorySpace.VMEM)] * 5,
        out_specs=pl.BlockSpec(memory_space=pltpu.MemorySpace.VMEM),
    )(patches, tab.astype(jnp.float32),
      packed["small"], packed["w1p"], packed["w2p"])


# ----------------------------------------------------------------------------
# Parameters
# ----------------------------------------------------------------------------
def make_params(key):
    ks = jax.random.split(key, 9)
    scale = 0.1

    def rnd(k, shape):
        return (scale * jax.random.normal(k, shape)).astype(jnp.float32)

    return {
        "wc": rnd(ks[0], (CKK, CONV_OUT)),
        "bc": rnd(ks[1], (1, CONV_OUT)),
        "wp": rnd(ks[2], (CONV_OUT, N_IMG_OUT)),
        "bp": rnd(ks[3], (1, N_IMG_OUT)),
        "w1": rnd(ks[4], (N_IMG_OUT + N_TAB, HID1)),   # fc1 weight, rows = [img ; tab]
        "b1": rnd(ks[5], (1, HID1)),
        "w2": rnd(ks[6], (HID1, HID2)),
        "b2": rnd(ks[7], (1, HID2)),
        "w3": rnd(ks[8], (HID2, N_OUT)),               # out, bias=False
    }


def pack_params(p):
    """Pack the many tiny parameters into 3 kernel inputs (done once, off the hot path)."""
    small = jnp.zeros((SMALL_ROWS, SMALL_COLS), jnp.float32)
    small = small.at[0:CKK, 0:CONV_OUT].set(p["wc"])
    small = small.at[CKK:CKK + 1, 0:CONV_OUT].set(p["bc"])
    small = small.at[WP_ROW:WP_ROW + CONV_OUT, 0:N_IMG_OUT].set(p["wp"])
    small = small.at[BP_ROW:BP_ROW + 1, 0:N_IMG_OUT].set(p["bp"])
    small = small.at[W3_ROW:W3_ROW + 1, 0:HID2].set(p["w3"].T)
    w1p = jnp.concatenate([p["w1"], p["b1"]], axis=0)   # (70, 256)
    w2p = jnp.concatenate([p["w2"], p["b2"]], axis=0)   # (257, 128)
    return {"small": small, "w1p": w1p, "w2p": w2p}


# ----------------------------------------------------------------------------
# Pure-JAX reference (mirrors the PyTorch module in eval mode)
# ----------------------------------------------------------------------------
def reference_forward(img_nchw, tab, p):
    img_nhwc = jnp.transpose(img_nchw, (0, 2, 3, 1)).astype(jnp.float32)
    patches = im2col_3x3(img_nhwc)                                   # (B, HWP, CKK)
    s = jnp.maximum(jnp.einsum("bpc,co->bpo", patches, p["wc"]) + p["bc"], 0.0)
    pooled = jnp.mean(s, axis=1)                                     # (B, 8)
    feat = jnp.maximum(pooled @ p["wp"] + p["bp"], 0.0)              # (B, 64)
    x = jnp.concatenate([feat, tab], axis=1)                         # (B, 69)
    h1 = jnp.maximum(x @ p["w1"] + p["b1"], 0.0)
    h2 = jnp.maximum(h1 @ p["w2"] + p["b2"], 0.0)
    return h2 @ p["w3"]


if __name__ == "__main__":
    key = jax.random.PRNGKey(0)
    k_img, k_tab, k_par = jax.random.split(key, 3)

    img = jax.random.normal(k_img, (B, C_IN, H, W), dtype=jnp.float32)   # NCHW input
    tab = jax.random.normal(k_tab, (B, N_TAB), dtype=jnp.float32)
    params = make_params(k_par)
    packed = pack_params(params)

    out = multimodal_forward(img, tab, packed)
    jax.block_until_ready(out)

    ref = reference_forward(img, tab, params)
    assert out.shape == (B, N_OUT)
    # tolerance allows for MXU matmul precision differences vs the XLA reference
    # (mean-pool realized as a matmul in the kernel); real bugs give O(1) errors.
    np.testing.assert_allclose(np.asarray(out), np.asarray(ref), rtol=2e-3, atol=1e-3)

    print("KERNEL_OK")
</pallas_src>

<mosaic_0001>
module attributes {stable_mosaic.version = 11 : i64} {
  func.func @_fused_kernel(%arg0: memref<512x36xf32, #tpu.memory_space<vmem>>, %arg1: memref<2x5xf32, #tpu.memory_space<vmem>>, %arg2: memref<64x128xf32, #tpu.memory_space<vmem>>, %arg3: memref<70x256xf32, #tpu.memory_space<vmem>>, %arg4: memref<257x128xf32, #tpu.memory_space<vmem>>, %arg5: memref<2x1xf32, #tpu.memory_space<vmem>>) attributes {dimension_semantics = [], scalar_prefetch = 0 : i64, scratch_operands = 0 : i64, tpu.core_type = #tpu.core_type<tc>} {
    %c0 = arith.constant 0 : index
    %c0_0 = arith.constant 0 : index
    %0 = vector.load %arg2[%c0, %c0_0] : memref<64x128xf32, #tpu.memory_space<vmem>>, vector<64x128xf32>
    %1 = vector.extract_strided_slice %0 {offsets = [0, 0], sizes = [36, 8], strides = [1, 1]} : vector<64x128xf32> to vector<36x8xf32>
    %2 = vector.extract_strided_slice %0 {offsets = [36, 0], sizes = [1, 8], strides = [1, 1]} : vector<64x128xf32> to vector<1x8xf32>
    %3 = vector.extract_strided_slice %0 {offsets = [40, 0], sizes = [8, 64], strides = [1, 1]} : vector<64x128xf32> to vector<8x64xf32>
    %4 = vector.extract_strided_slice %0 {offsets = [48, 0], sizes = [1, 64], strides = [1, 1]} : vector<64x128xf32> to vector<1x64xf32>
    %5 = vector.extract_strided_slice %0 {offsets = [56, 0], sizes = [1, 128], strides = [1, 1]} : vector<64x128xf32> to vector<1x128xf32>
    %c0_1 = arith.constant 0 : index
    %c0_2 = arith.constant 0 : index
    %6 = vector.load %arg0[%c0_1, %c0_2] : memref<512x36xf32, #tpu.memory_space<vmem>>, vector<512x36xf32>
    %cst = arith.constant dense<0.000000e+00> : vector<512x8xf32>
    %7 = tpu.matmul %6, %1, %cst {dimension_numbers = #tpu.dot_dimension_numbers<[1], [0], [0], [1], [0, 0, 1, 1], [], []>} : vector<512x36xf32>, vector<36x8xf32>, vector<512x8xf32> -> vector<512x8xf32>
    %8 = vector.broadcast %2 : vector<1x8xf32> to vector<512x8xf32>
    %9 = arith.addf %7, %8 : vector<512x8xf32>
    %cst_3 = arith.constant 0.000000e+00 : f32
    %10 = vector.broadcast %cst_3 : f32 to vector<512x8xf32>
    %11 = arith.maximumf %9, %10 : vector<512x8xf32>
    %12 = tpu.iota {dimensions = array<i32: 0>} : vector<2x512xi32>
    %13 = tpu.iota {dimensions = array<i32: 1>} : vector<2x512xi32>
    %c256_i32 = arith.constant 256 : i32
    %14 = vector.broadcast %c256_i32 : i32 to vector<2x512xi32>
    %15 = arith.muli %12, %14 : vector<2x512xi32>
    %16 = arith.cmpi sge, %13, %15 : vector<2x512xi32>
    %c256_i32_4 = arith.constant 256 : i32
    %17 = vector.broadcast %c256_i32_4 : i32 to vector<2x512xi32>
    %18 = arith.addi %15, %17 : vector<2x512xi32>
    %19 = arith.cmpi slt, %13, %18 : vector<2x512xi32>
    %20 = arith.andi %16, %19 : vector<2x512xi1>
    %cst_5 = arith.constant 3.906250e-03 : f32
    %cst_6 = arith.constant 0.000000e+00 : f32
    %21 = vector.broadcast %cst_5 : f32 to vector<2x512xf32>
    %22 = vector.broadcast %cst_6 : f32 to vector<2x512xf32>
    %23 = arith.select %20, %21, %22 : vector<2x512xi1>, vector<2x512xf32>
    %cst_7 = arith.constant dense<0.000000e+00> : vector<2x8xf32>
    %24 = tpu.matmul %23, %11, %cst_7 {dimension_numbers = #tpu.dot_dimension_numbers<[1], [0], [0], [1], [0, 0, 1, 1], [], []>} : vector<2x512xf32>, vector<512x8xf32>, vector<2x8xf32> -> vector<2x8xf32>
    %cst_8 = arith.constant dense<0.000000e+00> : vector<2x64xf32>
    %25 = tpu.matmul %24, %3, %cst_8 {dimension_numbers = #tpu.dot_dimension_numbers<[1], [0], [0], [1], [0, 0, 1, 1], [], []>} : vector<2x8xf32>, vector<8x64xf32>, vector<2x64xf32> -> vector<2x64xf32>
    %26 = vector.broadcast %4 : vector<1x64xf32> to vector<2x64xf32>
    %27 = arith.addf %25, %26 : vector<2x64xf32>
    %cst_9 = arith.constant 0.000000e+00 : f32
    %28 = vector.broadcast %cst_9 : f32 to vector<2x64xf32>
    %29 = arith.maximumf %27, %28 : vector<2x64xf32>
    %c0_10 = arith.constant 0 : index
    %c0_11 = arith.constant 0 : index
    %30 = vector.load %arg3[%c0_10, %c0_11] : memref<70x256xf32, #tpu.memory_space<vmem>>, vector<70x256xf32>
    %31 = vector.extract_strided_slice %30 {offsets = [0, 0], sizes = [64, 256], strides = [1, 1]} : vector<70x256xf32> to vector<64x256xf32>
    %32 = vector.extract_strided_slice %30 {offsets = [64, 0], sizes = [5, 256], strides = [1, 1]} : vector<70x256xf32> to vector<5x256xf32>
    %33 = vector.extract_strided_slice %30 {offsets = [69, 0], sizes = [1, 256], strides = [1, 1]} : vector<70x256xf32> to vector<1x256xf32>
    %cst_12 = arith.constant dense<0.000000e+00> : vector<2x256xf32>
    %34 = tpu.matmul %29, %31, %cst_12 {dimension_numbers = #tpu.dot_dimension_numbers<[1], [0], [0], [1], [0, 0, 1, 1], [], []>} : vector<2x64xf32>, vector<64x256xf32>, vector<2x256xf32> -> vector<2x256xf32>
    %c0_13 = arith.constant 0 : index
    %c0_14 = arith.constant 0 : index
    %35 = vector.load %arg1[%c0_13, %c0_14] : memref<2x5xf32, #tpu.memory_space<vmem>>, vector<2x5xf32>
    %cst_15 = arith.constant dense<0.000000e+00> : vector<2x256xf32>
    %36 = tpu.matmul %35, %32, %cst_15 {dimension_numbers = #tpu.dot_dimension_numbers<[1], [0], [0], [1], [0, 0, 1, 1], [], []>} : vector<2x5xf32>, vector<5x256xf32>, vector<2x256xf32> -> vector<2x256xf32>
    %37 = arith.addf %34, %36 : vector<2x256xf32>
    %38 = vector.broadcast %33 : vector<1x256xf32> to vector<2x256xf32>
    %39 = arith.addf %37, %38 : vector<2x256xf32>
    %cst_16 = arith.constant 0.000000e+00 : f32
    %40 = vector.broadcast %cst_16 : f32 to vector<2x256xf32>
    %41 = arith.maximumf %39, %40 : vector<2x256xf32>
    %c0_17 = arith.constant 0 : index
    %c0_18 = arith.constant 0 : index
    %42 = vector.load %arg4[%c0_17, %c0_18] : memref<257x128xf32, #tpu.memory_space<vmem>>, vector<257x128xf32>
    %43 = vector.extract_strided_slice %42 {offsets = [0, 0], sizes = [256, 128], strides = [1, 1]} : vector<257x128xf32> to vector<256x128xf32>
    %cst_19 = arith.constant dense<0.000000e+00> : vector<2x128xf32>
    %44 = tpu.matmul %41, %43, %cst_19 {dimension_numbers = #tpu.dot_dimension_numbers<[1], [0], [0], [1], [0, 0, 1, 1], [], []>} : vector<2x256xf32>, vector<256x128xf32>, vector<2x128xf32> -> vector<2x128xf32>
    %45 = vector.extract_strided_slice %42 {offsets = [256, 0], sizes = [1, 128], strides = [1, 1]} : vector<257x128xf32> to vector<1x128xf32>
    %46 = vector.broadcast %45 : vector<1x128xf32> to vector<2x128xf32>
    %47 = arith.addf %44, %46 : vector<2x128xf32>
    %cst_20 = arith.constant 0.000000e+00 : f32
    %48 = vector.broadcast %cst_20 : f32 to vector<2x128xf32>
    %49 = arith.maximumf %47, %48 : vector<2x128xf32>
    %50 = vector.broadcast %5 : vector<1x128xf32> to vector<2x128xf32>
    %51 = arith.mulf %49, %50 : vector<2x128xf32>
    %cst_21 = arith.constant dense<0.000000e+00> : vector<2xf32>
    %52 = vector.multi_reduction <add>, %51, %cst_21 [1] : vector<2x128xf32> to vector<2xf32>
    %53 = vector.shape_cast %52 : vector<2xf32> to vector<2x1xf32>
    %c0_22 = arith.constant 0 : index
    %c0_23 = arith.constant 0 : index
    %54 = vector.load %arg5[%c0_22, %c0_23] : memref<2x1xf32, #tpu.memory_space<vmem>>, vector<2x1xf32>
    tpu.vector_store %arg5[%c0_22, %c0_23], %53 {strides = array<i32>} : memref<2x1xf32, #tpu.memory_space<vmem>>, vector<2x1xf32>,
    return
  }
}

</mosaic_0001>

<bundles_post_ra>
// kernel: multimodal_forward.1
= control target key start
LH: loop header
LB: loop body
LE: loop exit
PB: predicated region body
PF: predicated region fallthrough
CT: control target
= control target key end

     0   :  { %vm96_vm0 = vcmask 293888   ;;  %vm289_vm1 = vcmask 1043456   ;;  %vm1786_vm14 = vmmov 0   ;;  %vm1009_vm15 = vcmask 1044480   ;;  %s2417_s2 = inlined_call_operand.vmem [shape: f32[64,128], index: 2, kind: input, shape index: {}]   ;;  %s2418_s0 = inlined_call_operand.vmem [shape: f32[512,36], index: 0, kind: input, shape index: {}]   ;;  %s2419_s3 = inlined_call_operand.vmem [shape: f32[70,256], index: 3, kind: input, shape index: {}]   ;;  %s2420_s1 = inlined_call_operand.vmem [shape: f32[2,5], index: 1, kind: input, shape index: {}]   ;;  %s2421_s4 = inlined_call_operand.vmem [shape: f32[257,128], index: 4, kind: input, shape index: {}]   ;;  %s2422_s5 = inlined_call_operand.vmem [shape: f32[2,1], index: 5, kind: output, shape index: {}]  }
   0x1   :  { %v20_v0 = vld [vmem:[%s2417_s2] sm:$0xff]  ;;  %v21_v1 = vld [vmem:[%s2417_s2 + $0x8] sm:$0xff]  ;;  %v22_v2 = vld [vmem:[%s2417_s2 + $0x10] sm:$0xff] }
   0x2   :  { %v1659_v3 = vpack.c.bf16 %v21_v1, %v20_v0  ;;  %v23_v4 = vld [vmem:[%s2417_s2 + $0x18] sm:$0xff]  ;;  %v28_v5 = vld [vmem:[%s2418_s0] sm:$0xff]  ;;  %v29_v8 = vld [vmem:[%s2418_s0 + $0x8] sm:$0xff] }
   0x3   :  { %v1663_v6 = vpack.c.bf16 %v23_v4, %v22_v2  ;;  %1558 = vmatprep.mubr.msk.f32.mxu0 %vm96_vm0, %v28_v5  ;;  %v1836_v7 = vld [vmem:[%s2417_s2 + $0x20] sm:$0xff]  ;;  %v30_v9 = vld [vmem:[%s2418_s0 + $0x10] sm:$0xff]  ;;  %v31_v10 = vld [vmem:[%s2418_s0 + $0x18] sm:$0xff] }
   0x4   :  { %1660 = vmatprep.subr.bf16.mxu0 %v1659_v3  ;;  %v32_v11 = vld [vmem:[%s2418_s0 + $0x20] sm:$0xff]  ;;  %v33_v12 = vld [vmem:[%s2418_s0 + $0x28] sm:$0xff]  ;;  %v34_v13 = vld [vmem:[%s2418_s0 + $0x30] sm:$0xff] }
   0x5   :  { %1662 = vmatpush3.bf16.msra.mxu0 %v1659_v3  ;;  %v35_v14 = vld [vmem:[%s2418_s0 + $0x38] sm:$0xff]  ;;  %v36_v15 = vld [vmem:[%s2418_s0 + $0x40] sm:$0xff]  ;;  %v37_v16 = vld [vmem:[%s2418_s0 + $0x48] sm:$0xff] }
   0x6   :  { %1664 = vmatprep.subr.bf16.mxu0 %v1663_v6  ;;  %v38_v17 = vld [vmem:[%s2418_s0 + $0x50] sm:$0xff]  ;;  %v39_v18 = vld [vmem:[%s2418_s0 + $0x58] sm:$0xff]  ;;  %v40_v19 = vld [vmem:[%s2418_s0 + $0x60] sm:$0xff] }
   0x7   :  { %v41_v20 = vld [vmem:[%s2418_s0 + $0x68] sm:$0xff]  ;;  %v42_v21 = vld [vmem:[%s2418_s0 + $0x70] sm:$0xff]  ;;  %v43_v22 = vld [vmem:[%s2418_s0 + $0x78] sm:$0xff] }
   0x8   :  { %v44_v23 = vld [vmem:[%s2418_s0 + $0x80] sm:$0xff]  ;;  %v45_v24 = vld [vmem:[%s2418_s0 + $0x88] sm:$0xff]  ;;  %v46_v25 = vld [vmem:[%s2418_s0 + $0x90] sm:$0xff] }
   0x9   :  { %1666 = vmatpush3.bf16.msra.mxu0 %v1663_v6  ;;  %v47_v26 = vld [vmem:[%s2418_s0 + $0x98] sm:$0xff]  ;;  %v48_v27 = vld [vmem:[%s2418_s0 + $0xa0] sm:$0xff]  ;;  %v49_v28 = vld [vmem:[%s2418_s0 + $0xa8] sm:$0xff] }
   0xa   :  { %1556 = vmatprep.subr.msk.mxu0 %vm289_vm1, %v1836_v7  ;;  %v50_v29 = vld [vmem:[%s2418_s0 + $0xb0] sm:$0xff]  ;;  %v51_v30 = vld [vmem:[%s2418_s0 + $0xb8] sm:$0xff]  ;;  %v52_v31 = vld [vmem:[%s2418_s0 + $0xc0] sm:$0xff] }
   0xb   :  { %v53_v32 = vld [vmem:[%s2418_s0 + $0xc8] sm:$0xff]  ;;  %v54_v33 = vld [vmem:[%s2418_s0 + $0xd0] sm:$0xff]  ;;  %v55_v34 = vld [vmem:[%s2418_s0 + $0xd8] sm:$0xff] }
   0xc   :  { %v56_v35 = vld [vmem:[%s2418_s0 + $0xe0] sm:$0xff]  ;;  %v57_v36 = vld [vmem:[%s2418_s0 + $0xe8] sm:$0xff]  ;;  %v58_v37 = vld [vmem:[%s2418_s0 + $0xf0] sm:$0xff] }
   0xd   :  { %1557 = vmatpush3.msk.msra.mxu0 %vm289_vm1, %v1836_v7  ;;  %v59_v38 = vld [vmem:[%s2418_s0 + $0xf8] sm:$0xff]  ;;  %v60_v39 = vld [vmem:[%s2418_s0 + $0x100] sm:$0xff]  ;;  %v61_v40 = vld [vmem:[%s2418_s0 + $0x108] sm:$0xff]  ;;  %vm1005_vm1 = vcmask 39936  }
   0xe   :  { %1559 = vmatmul.mubr.msk.f32.vlgmr.msra.gmra.mrb[0].mxu0 %vm96_vm0, %v29_v8  ;;  %v62_v41 = vld [vmem:[%s2418_s0 + $0x110] sm:$0xff]  ;;  %v63_v42 = vld [vmem:[%s2418_s0 + $0x118] sm:$0xff]  ;;  %v64_v43 = vld [vmem:[%s2418_s0 + $0x120] sm:$0xff]  ;;  %v92_v8 = vlaneseq }
   0xf   :  { %1561 = vmatprep.mubr.msk.f32.mxu0 %vm96_vm0, %v30_v9  ;;  %v65_v44 = vld [vmem:[%s2418_s0 + $0x128] sm:$0xff]  ;;  %v66_v45 = vld [vmem:[%s2418_s0 + $0x130] sm:$0xff]  ;;  %v67_v46 = vld [vmem:[%s2418_s0 + $0x138] sm:$0xff] }
  0x10   :  { %v68_v47 = vld [vmem:[%s2418_s0 + $0x140] sm:$0xff]  ;;  %v69_v48 = vld [vmem:[%s2418_s0 + $0x148] sm:$0xff]  ;;  %v70_v49 = vld [vmem:[%s2418_s0 + $0x150] sm:$0xff]  ;;  %v2092_v9 = vshrl.u32 %v92_v8, 7 }
  0x11   :  { %v71_v50 = vld [vmem:[%s2418_s0 + $0x158] sm:$0xff]  ;;  %v72_v51 = vld [vmem:[%s2418_s0 + $0x160] sm:$0xff]  ;;  %v73_v52 = vld [vmem:[%s2418_s0 + $0x168] sm:$0xff] }
  0x12   :  { %1562 = vmatmul.mubr.msk.f32.gmra.mrb[2].mxu0 %vm96_vm0, %v31_v10  ;;  %v74_v53 = vld [vmem:[%s2418_s0 + $0x170] sm:$0xff]  ;;  %v75_v54 = vld [vmem:[%s2418_s0 + $0x178] sm:$0xff]  ;;  %v76_v55 = vld [vmem:[%s2418_s0 + $0x180] sm:$0xff]  ;;  %v745_v10 = vand.u32 127, %v92_v8 }
  0x13   :  { %1564 = vmatprep.mubr.msk.f32.mxu0 %vm96_vm0, %v32_v11  ;;  %v77_v56 = vld [vmem:[%s2418_s0 + $0x188] sm:$0xff]  ;;  %v78_v57 = vld [vmem:[%s2418_s0 + $0x190] sm:$0xff]  ;;  %v79_v58 = vld [vmem:[%s2418_s0 + $0x198] sm:$0xff]  ;;  %v749_v11 = vmul.u32 256, %v2092_v9 }
  0x14   :  { %v80_v59 = vld [vmem:[%s2418_s0 + $0x1a0] sm:$0xff]  ;;  %v81_v60 = vld [vmem:[%s2418_s0 + $0x1a8] sm:$0xff]  ;;  %v82_v61 = vld [vmem:[%s2418_s0 + $0x1b0] sm:$0xff] }
  0x15   :  { %v83_v62 = vld [vmem:[%s2418_s0 + $0x1b8] sm:$0xff]  ;;  %v84_v63 = vld [vmem:[%s2418_s0 + $0x1c0] sm:$0xff]  ;;  %v85_v0 = vld [vmem:[%s2418_s0 + $0x1c8] sm:$0xff]  ;;  %vm750_vm5 = vcmp.ge.s32.totalorder %v745_v10, %v749_v11 }
  0x16   :  { %1565 = vmatmul.mubr.msk.f32.gmra.mrb[4].mxu0 %vm96_vm0, %v33_v12  ;;  %v86_v1 = vld [vmem:[%s2418_s0 + $0x1d0] sm:$0xff]  ;;  %v87_v2 = vld [vmem:[%s2418_s0 + $0x1d8] sm:$0xff]  ;;  %v88_v3 = vld [vmem:[%s2418_s0 + $0x1e0] sm:$0xff]  ;;  %v746_v12 = vadd.s32 128, %v745_v10 }
  0x17   :  { %1567 = vmatprep.mubr.msk.f32.mxu0 %vm96_vm0, %v34_v13  ;;  %v89_v4 = vld [vmem:[%s2418_s0 + $0x1e8] sm:$0xff]  ;;  %v90_v5 = vld [vmem:[%s2418_s0 + $0x1f0] sm:$0xff]  ;;  %v91_v6 = vld [vmem:[%s2418_s0 + $0x1f8] sm:$0xff]  ;;  %v754_v13 = vadd.s32 256, %v749_v11 }
  0x18   :  { %vm751_vm2 = vcmp.ge.s32.totalorder %v746_v12, %v749_v11 }
  0x19   :  { %vm756_vm3 = vcmp.lt.s32.totalorder %v746_v12, %v754_v13  ;;  %vm755_vm6 = vcmp.lt.s32.totalorder %v745_v10, %v754_v13 }
  0x1a   :  { %1568 = vmatmul.mubr.msk.f32.gmra.mrb[6].mxu0 %vm96_vm0, %v35_v14  ;;  %vm760_vm4 = vmand %vm751_vm2, %vm756_vm3  ;;  %v1784_v14 = vmov 0.00390625   ;;  %vm1087_vm2 = vcmask 523264   ;;  %vm1287_vm3 = vcmask 1041408  }
  0x1b   :  { %1570 = vmatprep.mubr.msk.f32.mxu0 %vm96_vm0, %v36_v15  ;;  %1362 = vmatprep.mubr.msk.f32.mxu1 %vm760_vm4, %v1784_v14  ;;  %vm2096_vm7 = vmand %vm750_vm5, %vm755_vm6  ;;  %vm1291_vm4 = vcmask 1024  }
  0x1e   :  { %1571 = vmatmul.mubr.msk.f32.gmra.mrb[8].mxu0 %vm96_vm0, %v37_v16  ;;  %v94_v16 = vsub.s32 4, %v2092_v9 }
  0x1f   :  { %1573 = vmatprep.mubr.msk.f32.mxu0 %vm96_vm0, %v38_v17 }
  0x20   :  { %v2102_v17 = vrot.slane %v1836_v7, %v94_v16 }
  0x22   :  { %1574 = vmatmul.mubr.msk.f32.gmra.mrb[10].mxu0 %vm96_vm0, %v39_v18 }
  0x23   :  { %1576 = vmatprep.mubr.msk.f32.mxu0 %vm96_vm0, %v40_v19 }
  0x26   :  { %1577 = vmatmul.mubr.msk.f32.gmra.mrb[12].mxu0 %vm96_vm0, %v41_v20 }
  0x27   :  { %1579 = vmatprep.mubr.msk.f32.mxu0 %vm96_vm0, %v42_v21 }
  0x2a   :  { %1580 = vmatmul.mubr.msk.f32.gmra.mrb[14].mxu0 %vm96_vm0, %v43_v22 }
  0x2b   :  { %1582 = vmatprep.mubr.msk.f32.mxu0 %vm96_vm0, %v44_v23  ;;  %v748_v23 = vadd.s32 384, %v745_v10 }
  0x2d   :  { %vm753_vm8 = vcmp.ge.s32.totalorder %v748_v23, %v749_v11  ;;  %vm758_vm9 = vcmp.lt.s32.totalorder %v748_v23, %v754_v13 }
  0x2e   :  { %1583 = vmatmul.mubr.msk.f32.gmra.mrb[16].mxu0 %vm96_vm0, %v45_v24  ;;  %vm2110_vm10 = vmand %vm753_vm8, %vm758_vm9 }
  0x2f   :  { %1585 = vmatprep.mubr.msk.f32.mxu0 %vm96_vm0, %v46_v25 }
  0x32   :  { %1586 = vmatmul.mubr.msk.f32.gmra.mrb[18].mxu0 %vm96_vm0, %v47_v26  ;;  %v747_v26 = vadd.s32 256, %v745_v10 }
  0x33   :  { %1588 = vmatprep.mubr.msk.f32.mxu0 %vm96_vm0, %v48_v27 }
  0x34   :  { %vm752_vm11 = vcmp.ge.s32.totalorder %v747_v26, %v749_v11  ;;  %vm757_vm12 = vcmp.lt.s32.totalorder %v747_v26, %v754_v13 }
  0x35   :  { %vm2114_vm13 = vmand %vm752_vm11, %vm757_vm12 }
  0x36   :  { %1589 = vmatmul.mubr.msk.f32.gmra.mrb[20].mxu0 %vm96_vm0, %v49_v28 }
  0x37   :  { %1591 = vmatprep.mubr.msk.f32.mxu0 %vm96_vm0, %v50_v29 }
  0x3a   :  { %1592 = vmatmul.mubr.msk.f32.gmra.mrb[22].mxu0 %vm96_vm0, %v51_v30 }
  0x3b   :  { %1594 = vmatprep.mubr.msk.f32.mxu0 %vm96_vm0, %v52_v31 }
  0x3e   :  { %1595 = vmatmul.mubr.msk.f32.gmra.mrb[24].mxu0 %vm96_vm0, %v53_v32 }
  0x3f   :  { %1597 = vmatprep.mubr.msk.f32.mxu0 %vm96_vm0, %v54_v33 }
  0x42   :  { %1598 = vmatmul.mubr.msk.f32.gmra.mrb[26].mxu0 %vm96_vm0, %v55_v34 }
  0x43   :  { %1600 = vmatprep.mubr.msk.f32.mxu0 %vm96_vm0, %v56_v35 }
  0x46   :  { %1601 = vmatmul.mubr.msk.f32.gmra.mrb[28].mxu0 %vm96_vm0, %v57_v36 }
  0x47   :  { %1603 = vmatprep.mubr.msk.f32.mxu0 %vm96_vm0, %v58_v37 }
  0x4a   :  { %1604 = vmatmul.mubr.msk.f32.gmra.mrb[30].mxu0 %vm96_vm0, %v59_v38 }
  0x4b   :  { %1606 = vmatprep.mubr.msk.f32.mxu0 %vm96_vm0, %v60_v39 }
  0x4e   :  { %1607 = vmatmul.mubr.msk.f32.gmra.mrb[32].mxu0 %vm96_vm0, %v61_v40 }
  0x4f   :  { %1609 = vmatprep.mubr.msk.f32.mxu0 %vm96_vm0, %v62_v41 }
  0x52   :  { %1610 = vmatmul.mubr.msk.f32.gmra.mrb[34].mxu0 %vm96_vm0, %v63_v42 }
  0x53   :  { %1612 = vmatprep.mubr.msk.f32.mxu0 %vm96_vm0, %v64_v43 }
  0x56   :  { %1613 = vmatmul.mubr.msk.f32.gmra.mrb[36].mxu0 %vm96_vm0, %v65_v44 }
  0x57   :  { %1615 = vmatprep.mubr.msk.f32.mxu0 %vm96_vm0, %v66_v45 }
  0x5a   :  { %1616 = vmatmul.mubr.msk.f32.gmra.mrb[38].mxu0 %vm96_vm0, %v67_v46 }
  0x5b   :  { %1618 = vmatprep.mubr.msk.f32.mxu0 %vm96_vm0, %v68_v47 }
  0x5e   :  { %1619 = vmatmul.mubr.msk.f32.gmra.mrb[40].mxu0 %vm96_vm0, %v69_v48 }
  0x5f   :  { %1621 = vmatprep.mubr.msk.f32.mxu0 %vm96_vm0, %v70_v49 }
  0x62   :  { %1622 = vmatmul.mubr.msk.f32.gmra.mrb[42].mxu0 %vm96_vm0, %v71_v50 }
  0x63   :  { %1624 = vmatprep.mubr.msk.f32.mxu0 %vm96_vm0, %v72_v51 }
  0x66   :  { %1625 = vmatmul.mubr.msk.f32.gmra.mrb[44].mxu0 %vm96_vm0, %v73_v52 }
  0x67   :  { %1627 = vmatprep.mubr.msk.f32.mxu0 %vm96_vm0, %v74_v53 }
  0x6a   :  { %1628 = vmatmul.mubr.msk.f32.gmra.mrb[46].mxu0 %vm96_vm0, %v75_v54 }
  0x6b   :  { %1630 = vmatprep.mubr.msk.f32.mxu0 %vm96_vm0, %v76_v55 }
  0x6e   :  { %1631 = vmatmul.mubr.msk.f32.gmra.mrb[48].mxu0 %vm96_vm0, %v77_v56 }
  0x6f   :  { %1633 = vmatprep.mubr.msk.f32.mxu0 %vm96_vm0, %v78_v57 }
  0x72   :  { %1634 = vmatmul.mubr.msk.f32.gmra.mrb[50].mxu0 %vm96_vm0, %v79_v58 }
  0x73   :  { %1636 = vmatprep.mubr.msk.f32.mxu0 %vm96_vm0, %v80_v59 }
  0x76   :  { %1637 = vmatmul.mubr.msk.f32.gmra.mrb[52].mxu0 %vm96_vm0, %v81_v60 }
  0x77   :  { %1639 = vmatprep.mubr.msk.f32.mxu0 %vm96_vm0, %v82_v61 }
  0x7a   :  { %1640 = vmatmul.mubr.msk.f32.gmra.mrb[54].mxu0 %vm96_vm0, %v83_v62 }
  0x7b   :  { %1642 = vmatprep.mubr.msk.f32.mxu0 %vm96_vm0, %v84_v63 }
  0x7e   :  { %1643 = vmatmul.mubr.msk.f32.gmra.mrb[56].mxu0 %vm96_vm0, %v85_v0 }
  0x7f   :  { %1645 = vmatprep.mubr.msk.f32.mxu0 %vm96_vm0, %v86_v1 }
  0x82   :  { %1646 = vmatmul.mubr.msk.f32.gmra.mrb[58].mxu0 %vm96_vm0, %v87_v2 }
  0x83   :  { %1648 = vmatprep.mubr.msk.f32.mxu0 %vm96_vm0, %v88_v3 }
  0x86   :  { %1649 = vmatmul.mubr.msk.f32.gmra.mrb[60].mxu0 %vm96_vm0, %v89_v4 }
  0x87   :  { %1651 = vmatprep.mubr.msk.f32.mxu0 %vm96_vm0, %v90_v5 }
  0x8a   :  { %1652 = vmatmul.mubr.msk.f32.gmra.mrb[62].mxu0 %vm96_vm0, %v91_v6  ;;  %vm911_vm0 = vcmask 64512  }
  0xe1   :  { %v1560_v18 = vpop.f32.mrb[0].mxu0 }
  0xe2   :  { %v365_v19 = vadd.f32 %v1560_v18, %v2102_v17  ;;  %v359_v20 = vpop.f32.mrb[1].mxu0 }
  0xe3   :  { %v360_v21 = vadd.f32 %v359_v20, %v2102_v17 }
  0xe4   :  { %v679_v22 = vmax.f32 %v365_v19, 0.0 }
  0xe5   :  { %v678_v24 = vmax.f32 %v360_v21, 0.0  ;;  %v1563_v25 = vpop.f32.mrb[2].mxu0 }
  0xe6   :  { %v375_v27 = vadd.f32 %v1563_v25, %v2102_v17  ;;  %v369_v28 = vpop.f32.mrb[3].mxu0 }
  0xe7   :  { %v370_v29 = vadd.f32 %v369_v28, %v2102_v17  ;;  %v2108_v7 = vpack.c.bf16 %v679_v22, %v678_v24 }
  0xe8   :  { %v681_v31 = vmax.f32 %v375_v27, 0.0 }
  0xe9   :  { %v680_v33 = vmax.f32 %v370_v29, 0.0  ;;  %v1566_v34 = vpop.f32.mrb[4].mxu0 }
  0xea   :  { %v385_v35 = vadd.f32 %v1566_v34, %v2102_v17  ;;  %v379_v36 = vpop.f32.mrb[5].mxu0 }
  0xeb   :  { %v2119_v37 = vpack.c.bf16 %v681_v31, %v680_v33  ;;  %v380_v38 = vadd.f32 %v379_v36, %v2102_v17 }
  0xec   :  { %v683_v39 = vmax.f32 %v385_v35, 0.0 }
  0xed   :  { %v682_v40 = vmax.f32 %v380_v38, 0.0  ;;  %v1569_v41 = vpop.f32.mrb[6].mxu0 }
  0xee   :  { %v395_v42 = vadd.f32 %v1569_v41, %v2102_v17  ;;  %v389_v43 = vpop.f32.mrb[7].mxu0 }
  0xef   :  { %v2123_v44 = vpack.c.bf16 %v683_v39, %v682_v40  ;;  %v390_v45 = vadd.f32 %v389_v43, %v2102_v17 }
  0xf0   :  { %v685_v46 = vmax.f32 %v395_v42, 0.0 }
  0xf1   :  { %v684_v47 = vmax.f32 %v390_v45, 0.0  ;;  %v1572_v48 = vpop.f32.mrb[8].mxu0 }
  0xf2   :  { %v405_v49 = vadd.f32 %v1572_v48, %v2102_v17  ;;  %v399_v50 = vpop.f32.mrb[9].mxu0 }
  0xf3   :  { %v2127_v51 = vpack.c.bf16 %v685_v46, %v684_v47  ;;  %v400_v52 = vadd.f32 %v399_v50, %v2102_v17 }
  0xf4   :  { %v687_v53 = vmax.f32 %v405_v49, 0.0 }
  0xf5   :  { %v686_v54 = vmax.f32 %v400_v52, 0.0  ;;  %v1575_v55 = vpop.f32.mrb[10].mxu0 }
  0xf6   :  { %v415_v56 = vadd.f32 %v1575_v55, %v2102_v17  ;;  %v409_v57 = vpop.f32.mrb[11].mxu0 }
  0xf7   :  { %v2131_v58 = vpack.c.bf16 %v687_v53, %v686_v54  ;;  %v410_v59 = vadd.f32 %v409_v57, %v2102_v17 }
  0xf8   :  { %v689_v60 = vmax.f32 %v415_v56, 0.0 }
  0xf9   :  { %v688_v61 = vmax.f32 %v410_v59, 0.0  ;;  %v1578_v62 = vpop.f32.mrb[12].mxu0 }
  0xfa   :  { %v425_v63 = vadd.f32 %v1578_v62, %v2102_v17  ;;  %v419_v0 = vpop.f32.mrb[13].mxu0 }
  0xfb   :  { %v2135_v1 = vpack.c.bf16 %v689_v60, %v688_v61  ;;  %v420_v2 = vadd.f32 %v419_v0, %v2102_v17 }
  0xfc   :  { %v691_v3 = vmax.f32 %v425_v63, 0.0 }
  0xfd   :  { %v690_v4 = vmax.f32 %v420_v2, 0.0  ;;  %v1581_v5 = vpop.f32.mrb[14].mxu0 }
  0xfe   :  { %v435_v6 = vadd.f32 %v1581_v5, %v2102_v17  ;;  %v429_v8 = vpop.f32.mrb[15].mxu0 }
  0xff   :  { %v2139_v10 = vpack.c.bf16 %v691_v3, %v690_v4  ;;  %v430_v11 = vadd.f32 %v429_v8, %v2102_v17 }
 0x100   :  { %v693_v12 = vmax.f32 %v435_v6, 0.0 }
 0x101   :  { %v692_v13 = vmax.f32 %v430_v11, 0.0  ;;  %v1584_v16 = vpop.f32.mrb[16].mxu0 }
 0x102   :  { %v445_v18 = vadd.f32 %v1584_v16, %v2102_v17  ;;  %v439_v19 = vpop.f32.mrb[17].mxu0 }
 0x103   :  { %v2143_v20 = vpack.c.bf16 %v693_v12, %v692_v13  ;;  %v440_v21 = vadd.f32 %v439_v19, %v2102_v17 }
 0x104   :  { %v695_v22 = vmax.f32 %v445_v18, 0.0 }
 0x105   :  { %v694_v23 = vmax.f32 %v440_v21, 0.0  ;;  %v1587_v24 = vpop.f32.mrb[18].mxu0 }
 0x106   :  { %v455_v25 = vadd.f32 %v1587_v24, %v2102_v17  ;;  %v449_v26 = vpop.f32.mrb[19].mxu0 }
 0x107   :  { %v450_v27 = vadd.f32 %v449_v26, %v2102_v17  ;;  %v1667_v28 = vpack.c.bf16 %v695_v22, %v694_v23 }
 0x108   :  { %v697_v29 = vmax.f32 %v455_v25, 0.0 }
 0x109   :  { %v696_v31 = vmax.f32 %v450_v27, 0.0  ;;  %v1590_v33 = vpop.f32.mrb[20].mxu0  ;;  %1668 = vmatprep.subr.bf16.mxu1 %v1667_v28 }
 0x10a   :  { %v465_v34 = vadd.f32 %v1590_v33, %v2102_v17  ;;  %v459_v35 = vpop.f32.mrb[21].mxu0  ;;  %1670 = vmatpush3.bf16.msra.mxu1 %v2108_v7 }
 0x10b   :  { %v1671_v36 = vpack.c.bf16 %v697_v29, %v696_v31  ;;  %v460_v38 = vadd.f32 %v459_v35, %v2102_v17 }
 0x10c   :  { %v699_v39 = vmax.f32 %v465_v34, 0.0 }
 0x10d   :  { %v698_v40 = vmax.f32 %v460_v38, 0.0  ;;  %v1593_v41 = vpop.f32.mrb[22].mxu0  ;;  %1672 = vmatprep.subr.bf16.mxu1 %v1671_v36 }
 0x10e   :  { %v475_v42 = vadd.f32 %v1593_v41, %v2102_v17  ;;  %v469_v43 = vpop.f32.mrb[23].mxu0  ;;  %1674 = vmatpush3.bf16.msra.mxu1 %v2119_v37 }
 0x10f   :  { %v1675_v45 = vpack.c.bf16 %v699_v39, %v698_v40  ;;  %v470_v46 = vadd.f32 %v469_v43, %v2102_v17 }
 0x110   :  { %v701_v47 = vmax.f32 %v475_v42, 0.0 }
 0x111   :  { %v700_v48 = vmax.f32 %v470_v46, 0.0  ;;  %v1596_v49 = vpop.f32.mrb[24].mxu0  ;;  %1676 = vmatprep.subr.bf16.mxu1 %v1675_v45 }
 0x112   :  { %v485_v7 = vadd.f32 %v1596_v49, %v2102_v17  ;;  %v479_v50 = vpop.f32.mrb[25].mxu0  ;;  %1678 = vmatpush3.bf16.msra.mxu1 %v2123_v44 }
 0x113   :  { %v1679_v52 = vpack.c.bf16 %v701_v47, %v700_v48  ;;  %v480_v53 = vadd.f32 %v479_v50, %v2102_v17 }
 0x114   :  { %v703_v54 = vmax.f32 %v485_v7, 0.0 }
 0x115   :  { %v702_v55 = vmax.f32 %v480_v53, 0.0  ;;  %v1599_v56 = vpop.f32.mrb[26].mxu0  ;;  %1680 = vmatprep.subr.bf16.mxu1 %v1679_v52 }
 0x116   :  { %v495_v37 = vadd.f32 %v1599_v56, %v2102_v17  ;;  %v489_v57 = vpop.f32.mrb[27].mxu0  ;;  %1682 = vmatpush3.bf16.msra.mxu1 %v2127_v51 }
 0x117   :  { %v1683_v59 = vpack.c.bf16 %v703_v54, %v702_v55  ;;  %v490_v60 = vadd.f32 %v489_v57, %v2102_v17 }
 0x118   :  { %v705_v61 = vmax.f32 %v495_v37, 0.0 }
 0x119   :  { %v704_v62 = vmax.f32 %v490_v60, 0.0  ;;  %v1602_v63 = vpop.f32.mrb[28].mxu0  ;;  %1684 = vmatprep.subr.bf16.mxu1 %v1683_v59 }
 0x11a   :  { %v505_v44 = vadd.f32 %v1602_v63, %v2102_v17  ;;  %v499_v0 = vpop.f32.mrb[29].mxu0  ;;  %1686 = vmatpush3.bf16.msra.mxu1 %v2131_v58 }
 0x11b   :  { %v1687_v2 = vpack.c.bf16 %v705_v61, %v704_v62  ;;  %v500_v3 = vadd.f32 %v499_v0, %v2102_v17 }
 0x11c   :  { %v707_v4 = vmax.f32 %v505_v44, 0.0 }
 0x11d   :  { %v706_v5 = vmax.f32 %v500_v3, 0.0  ;;  %v1605_v6 = vpop.f32.mrb[30].mxu0  ;;  %1688 = vmatprep.subr.bf16.mxu1 %v1687_v2 }
 0x11e   :  { %v515_v51 = vadd.f32 %v1605_v6, %v2102_v17  ;;  %v509_v8 = vpop.f32.mrb[31].mxu0  ;;  %1690 = vmatpush3.bf16.msra.mxu1 %v2135_v1 }
 0x11f   :  { %v1691_v11 = vpack.c.bf16 %v707_v4, %v706_v5  ;;  %v510_v12 = vadd.f32 %v509_v8, %v2102_v17 }
 0x120   :  { %v709_v13 = vmax.f32 %v515_v51, 0.0 }
 0x121   :  { %v708_v16 = vmax.f32 %v510_v12, 0.0  ;;  %v1608_v18 = vpop.f32.mrb[32].mxu0  ;;  %1692 = vmatprep.subr.bf16.mxu1 %v1691_v11 }
 0x122   :  { %v525_v58 = vadd.f32 %v1608_v18, %v2102_v17  ;;  %v519_v19 = vpop.f32.mrb[33].mxu0  ;;  %1694 = vmatpush3.bf16.msra.mxu1 %v2139_v10 }
 0x123   :  { %v1695_v21 = vpack.c.bf16 %v709_v13, %v708_v16  ;;  %v520_v22 = vadd.f32 %v519_v19, %v2102_v17 }
 0x124   :  { %v711_v23 = vmax.f32 %v525_v58, 0.0 }
 0x125   :  { %v710_v24 = vmax.f32 %v520_v22, 0.0  ;;  %v1611_v25 = vpop.f32.mrb[34].mxu0  ;;  %1696 = vmatprep.subr.bf16.mxu1 %v1695_v21 }
 0x126   :  { %v535_v1 = vadd.f32 %v1611_v25, %v2102_v17  ;;  %v529_v26 = vpop.f32.mrb[35].mxu0  ;;  %1698 = vmatpush3.bf16.msra.mxu1 %v2143_v20 }
 0x127   :  { %v2171_v27 = vpack.c.bf16 %v711_v23, %v710_v24  ;;  %v530_v28 = vadd.f32 %v529_v26, %v2102_v17 }
 0x128   :  { %v713_v29 = vmax.f32 %v535_v1, 0.0 }
 0x129   :  { %v712_v31 = vmax.f32 %v530_v28, 0.0  ;;  %v1614_v33 = vpop.f32.mrb[36].mxu0  ;;  %1363 = vmatmul.mubr.msk.f32.vlgmr.msra.gmra.mrb[0].mxu1 %vm2096_vm7, %v1784_v14 }
 0x12a   :  { %v545_v10 = vadd.f32 %v1614_v33, %v2102_v17  ;;  %v539_v34 = vpop.f32.mrb[37].mxu0  ;;  %1364 = vmatprep.mubr.msk.f32.mxu1 %vm2110_vm10, %v1784_v14 }
 0x12b   :  { %v2181_v35 = vpack.c.bf16 %v713_v29, %v712_v31  ;;  %v540_v20 = vadd.f32 %v539_v34, %v2102_v17 }
 0x12c   :  { %v715_v36 = vmax.f32 %v545_v10, 0.0 }
 0x12d   :  { %v714_v38 = vmax.f32 %v540_v20, 0.0  ;;  %v1617_v39 = vpop.f32.mrb[38].mxu0 }
 0x12e   :  { %v555_v40 = vadd.f32 %v1617_v39, %v2102_v17  ;;  %v549_v41 = vpop.f32.mrb[39].mxu0 }
 0x12f   :  { %v2185_v42 = vpack.c.bf16 %v715_v36, %v714_v38  ;;  %v550_v15 = vadd.f32 %v549_v41, %v2102_v17 }
 0x130   :  { %v717_v43 = vmax.f32 %v555_v40, 0.0 }
 0x131   :  { %v716_v45 = vmax.f32 %v550_v15, 0.0  ;;  %v1620_v46 = vpop.f32.mrb[40].mxu0 }
 0x132   :  { %v565_v30 = vadd.f32 %v1620_v46, %v2102_v17  ;;  %v559_v47 = vpop.f32.mrb[41].mxu0 }
 0x133   :  { %v2189_v48 = vpack.c.bf16 %v717_v43, %v716_v45  ;;  %v560_v49 = vadd.f32 %v559_v47, %v2102_v17 }
 0x134   :  { %v719_v7 = vmax.f32 %v565_v30, 0.0 }
 0x135   :  { %v718_v50 = vmax.f32 %v560_v49, 0.0  ;;  %v1623_v52 = vpop.f32.mrb[42].mxu0 }
 0x136   :  { %v575_v53 = vadd.f32 %v1623_v52, %v2102_v17  ;;  %v569_v54 = vpop.f32.mrb[43].mxu0 }
 0x137   :  { %v2193_v55 = vpack.c.bf16 %v719_v7, %v718_v50  ;;  %v570_v56 = vadd.f32 %v569_v54, %v2102_v17 }
 0x138   :  { %v721_v37 = vmax.f32 %v575_v53, 0.0 }
 0x139   :  { %v720_v57 = vmax.f32 %v570_v56, 0.0  ;;  %v1626_v59 = vpop.f32.mrb[44].mxu0 }
 0x13a   :  { %v585_v60 = vadd.f32 %v1626_v59, %v2102_v17  ;;  %v579_v61 = vpop.f32.mrb[45].mxu0 }
 0x13b   :  { %v2197_v62 = vpack.c.bf16 %v721_v37, %v720_v57  ;;  %v580_v63 = vadd.f32 %v579_v61, %v2102_v17 }
 0x13c   :  { %v723_v44 = vmax.f32 %v585_v60, 0.0 }
 0x13d   :  { %v722_v0 = vmax.f32 %v580_v63, 0.0  ;;  %v1629_v2 = vpop.f32.mrb[46].mxu0 }
 0x13e   :  { %v595_v3 = vadd.f32 %v1629_v2, %v2102_v17  ;;  %v589_v4 = vpop.f32.mrb[47].mxu0 }
 0x13f   :  { %v2201_v5 = vpack.c.bf16 %v723_v44, %v722_v0  ;;  %v590_v6 = vadd.f32 %v589_v4, %v2102_v17 }
 0x140   :  { %v725_v51 = vmax.f32 %v595_v3, 0.0 }
 0x141   :  { %v724_v8 = vmax.f32 %v590_v6, 0.0  ;;  %v1632_v11 = vpop.f32.mrb[48].mxu0 }
 0x142   :  { %v605_v12 = vadd.f32 %v1632_v11, %v2102_v17  ;;  %v599_v13 = vpop.f32.mrb[49].mxu0 }
 0x143   :  { %v2205_v16 = vpack.c.bf16 %v725_v51, %v724_v8  ;;  %v600_v18 = vadd.f32 %v599_v13, %v2102_v17  ;;  %v1785_v8 = vmov 0.0   ;;  %v987_v13 = vld [vmem:[%s2419_s3 + $0x8] sm:$0xff] }
 0x144   :  { %v727_v58 = vmax.f32 %v605_v12, 0.0 }
 0x145   :  { %v726_v19 = vmax.f32 %v600_v18, 0.0  ;;  %v1635_v21 = vpop.f32.mrb[50].mxu0 }
 0x146   :  { %v615_v22 = vadd.f32 %v1635_v21, %v2102_v17  ;;  %v609_v23 = vpop.f32.mrb[51].mxu0 }
 0x147   :  { %v1699_v24 = vpack.c.bf16 %v727_v58, %v726_v19  ;;  %v610_v25 = vadd.f32 %v609_v23, %v2102_v17  ;;  %v2252_v19 = vld [vmem:[%s2419_s3 + $0x80] sm:$0x3f]  ;;  %v988_v23 = vld [vmem:[%s2419_s3 + $0x10] sm:$0xff] }
 0x148   :  { %v729_v1 = vmax.f32 %v615_v22, 0.0  ;;  %v986_v22 = vld [vmem:[%s2419_s3] sm:$0xff] }
 0x149   :  { %v728_v26 = vmax.f32 %v610_v25, 0.0  ;;  %v1638_v28 = vpop.f32.mrb[52].mxu0  ;;  %1700 = vmatprep.subr.bf16.mxu1 %v1699_v24  ;;  %v991_v24 = vld [vmem:[%s2419_s3 + $0x28] sm:$0xff]  ;;  %v993_v25 = vld [vmem:[%s2419_s3 + $0x38] sm:$0xff] }
 0x14a   :  { %v625_v29 = vadd.f32 %v1638_v28, %v2102_v17  ;;  %v619_v31 = vpop.f32.mrb[53].mxu0  ;;  %1702 = vmatpush3.bf16.msra.mxu1 %v2171_v27  ;;  %v1735_v28 = vpack.c.bf16 %v993_v25, %v991_v24  ;;  %v1185_v24 = vld [vmem:[%s2421_s4 + $0x58] sm:$0xff]  ;;  %v1202_v25 = vld [vmem:[%s2421_s4 + $0xe0] sm:$0xff] }
 0x14b   :  { %v1703_v33 = vpack.c.bf16 %v729_v1, %v728_v26  ;;  %v620_v10 = vadd.f32 %v619_v31, %v2102_v17  ;;  %v1004_v1 = vld [vmem:[%s2420_s1] sm:$0x3]  ;;  %v1733_v26 = vpack.c.bf16 %v988_v23, %v986_v22  ;;  %v992_v31 = vld [vmem:[%s2419_s3 + $0x30] sm:$0xff] }
 0x14c   :  { %v731_v34 = vmax.f32 %v625_v29, 0.0  ;;  %v990_v29 = vld [vmem:[%s2419_s3 + $0x20] sm:$0xff]  ;;  %v1184_v23 = vld [vmem:[%s2421_s4 + $0x50] sm:$0xff] }
 0x14d   :  { %v730_v20 = vmax.f32 %v620_v10, 0.0  ;;  %v1641_v36 = vpop.f32.mrb[54].mxu0  ;;  %1704 = vmatprep.subr.bf16.mxu1 %v1703_v33  ;;  %v995_v33 = vld [vmem:[%s2419_s3 + $0x48] sm:$0xff]  ;;  %v997_v10 = vld [vmem:[%s2419_s3 + $0x58] sm:$0xff] }
 0x14e   :  { %v635_v38 = vadd.f32 %v1641_v36, %v2102_v17  ;;  %v629_v39 = vpop.f32.mrb[55].mxu0  ;;  %1706 = vmatpush3.bf16.msra.mxu1 %v2181_v35  ;;  %v994_v36 = vld [vmem:[%s2419_s3 + $0x40] sm:$0xff] }
 0x14f   :  { %v1707_v40 = vpack.c.bf16 %v731_v34, %v730_v20  ;;  %v630_v41 = vadd.f32 %v629_v39, %v2102_v17  ;;  %v1737_v34 = vpack.c.bf16 %v992_v31, %v990_v29  ;;  %v1739_v20 = vpack.c.bf16 %v997_v10, %v995_v33  ;;  %v1186_v29 = vld [vmem:[%s2421_s4 + $0x60] sm:$0xff]  ;;  %v1187_v31 = vld [vmem:[%s2421_s4 + $0x68] sm:$0xff]  ;;  %v1204_v10 = vld [vmem:[%s2421_s4 + $0xf0] sm:$0xff] }
 0x150   :  { %v733_v15 = vmax.f32 %v635_v38, 0.0  ;;  %v996_v38 = vld [vmem:[%s2419_s3 + $0x50] sm:$0xff]  ;;  %v1773_v33 = vpack.c.bf16 %v1187_v31, %v1186_v29 }
 0x151   :  { %v732_v43 = vmax.f32 %v630_v41, 0.0  ;;  %v1644_v45 = vpop.f32.mrb[56].mxu0  ;;  %1708 = vmatprep.subr.bf16.mxu1 %v1707_v40  ;;  %v1741_v39 = vpack.c.bf16 %v996_v38, %v994_v36  ;;  %v999_v40 = vld [vmem:[%s2419_s3 + $0x68] sm:$0xff]  ;;  %v1001_v41 = vld [vmem:[%s2419_s3 + $0x78] sm:$0xff]  ;;  %v1188_v36 = vld [vmem:[%s2421_s4 + $0x70] sm:$0xff] }
 0x152   :  { %v645_v27 = vadd.f32 %v1644_v45, %v2102_v17  ;;  %v639_v46 = vpop.f32.mrb[57].mxu0  ;;  %1710 = vmatpush3.bf16.msra.mxu1 %v2185_v42  ;;  %v1000_v45 = vld [vmem:[%s2419_s3 + $0x70] sm:$0xff]  ;;  %v1189_v38 = vld [vmem:[%s2421_s4 + $0x78] sm:$0xff] }
 0x153   :  { %v1711_v30 = vpack.c.bf16 %v733_v15, %v732_v43  ;;  %v640_v47 = vadd.f32 %v639_v46, %v2102_v17  ;;  %v1743_v15 = vpack.c.bf16 %v1001_v41, %v999_v40  ;;  %v998_v43 = vld [vmem:[%s2419_s3 + $0x60] sm:$0xff]  ;;  %v1164_v40 = vsub.s32 5, %v2092_v9 }
 0x154   :  { %v735_v49 = vmax.f32 %v645_v27, 0.0  ;;  %v1745_v27 = vpack.c.bf16 %v1000_v45, %v998_v43  ;;  %v1190_v46 = vld [vmem:[%s2421_s4 + $0x80] sm:$0xff] }
 0x155   :  { %v734_v7 = vmax.f32 %v640_v47, 0.0  ;;  %v1647_v50 = vpop.f32.mrb[58].mxu0  ;;  %1712 = vmatprep.subr.bf16.mxu1 %v1711_v30  ;;  %v1191_v30 = vld [vmem:[%s2421_s4 + $0x88] sm:$0xff]  ;;  %v1165_v41 = vrot.slane %v2252_v19, %v1164_v40 }
 0x156   :  { %v655_v35 = vadd.f32 %v1647_v50, %v2102_v17  ;;  %v649_v52 = vpop.f32.mrb[59].mxu0  ;;  %1714 = vmatpush3.bf16.msra.mxu1 %v2189_v48  ;;  %v1747_v47 = vpack.c.bf16 %v1191_v30, %v1190_v46 }
 0x157   :  { %v1715_v53 = vpack.c.bf16 %v735_v49, %v734_v7  ;;  %v650_v54 = vadd.f32 %v649_v52, %v2102_v17  ;;  %v909_v49 = vsub.s32 0, %v2092_v9  ;;  %v26_v7 = vld [vmem:[%s2417_s2 + $0x30] sm:$0xff]  ;;  %v1175_v52 = vld [vmem:[%s2421_s4 + $0x8] sm:$0xff] }
 0x158   :  { %v737_v56 = vmax.f32 %v655_v35, 0.0  ;;  %v1174_v35 = vld [vmem:[%s2421_s4] sm:$0xff] }
 0x159   :  { %v736_v37 = vmax.f32 %v650_v54, 0.0  ;;  %v1650_v57 = vpop.f32.mrb[60].mxu0  ;;  %1716 = vmatprep.subr.bf16.mxu1 %v1715_v53  ;;  %v910_v50 = vrot.slane %v26_v7, %v909_v49  ;;  %v1192_v54 = vld [vmem:[%s2421_s4 + $0x90] sm:$0xff] }
 0x15a   :  { %v665_v42 = vadd.f32 %v1650_v57, %v2102_v17  ;;  %v659_v59 = vpop.f32.mrb[61].mxu0  ;;  %1718 = vmatpush3.bf16.msra.mxu1 %v2193_v55 }
 0x15b   :  { %v1719_v60 = vpack.c.bf16 %v737_v56, %v736_v37  ;;  %v660_v61 = vadd.f32 %v659_v59, %v2102_v17  ;;  %v1193_v56 = vld [vmem:[%s2421_s4 + $0x98] sm:$0xff] }
 0x15c   :  { %v739_v63 = vmax.f32 %v665_v42, 0.0  ;;  %v1749_v42 = vpack.c.bf16 %v1175_v52, %v1174_v35 }
 0x15d   :  { %v738_v44 = vmax.f32 %v660_v61, 0.0  ;;  %v1653_v0 = vpop.f32.mrb[62].mxu0  ;;  %1720 = vmatprep.subr.bf16.mxu1 %v1719_v60  ;;  %v1751_v60 = vpack.c.bf16 %v1193_v56, %v1192_v54  ;;  %v1176_v61 = vld [vmem:[%s2421_s4 + $0x10] sm:$0xff] }
 0x15e   :  { %v675_v48 = vadd.f32 %v1653_v0, %v2102_v17  ;;  %v669_v2 = vpop.f32.mrb[63].mxu0  ;;  %1722 = vmatpush3.bf16.msra.mxu1 %v2197_v62  ;;  %v25_v62 = vld [vmem:[%s2417_s2 + $0x28] sm:$0xff] }
 0x15f   :  { %v1723_v3 = vpack.c.bf16 %v739_v63, %v738_v44  ;;  %v670_v4 = vadd.f32 %v669_v2, %v2102_v17  ;;  %v2239_v17 = vld [vmem:[%s2419_s3 + $0x88] sm:$0x3f]  ;;  %v1177_v63 = vld [vmem:[%s2421_s4 + $0x18] sm:$0xff]  ;;  %v1194_v44 = vld [vmem:[%s2421_s4 + $0xa0] sm:$0xff] }
 0x160   :  { %v741_v6 = vmax.f32 %v675_v48, 0.0  ;;  %v1195_v0 = vld [vmem:[%s2421_s4 + $0xa8] sm:$0xff]  ;;  %v1753_v48 = vpack.c.bf16 %v1177_v63, %v1176_v61 }
 0x161   :  { %v740_v51 = vmax.f32 %v670_v4, 0.0  ;;  %1724 = vmatprep.subr.bf16.mxu1 %v1723_v3  ;;  %v1755_v2 = vpack.c.bf16 %v1195_v0, %v1194_v44  ;;  %v1178_v3 = vld [vmem:[%s2421_s4 + $0x20] sm:$0xff]  ;;  %v1179_v4 = vld [vmem:[%s2421_s4 + $0x28] sm:$0xff] }
 0x162   :  { %1726 = vmatpush3.bf16.msra.mxu1 %v2201_v5 }
 0x163   :  { %v1727_v55 = vpack.c.bf16 %v741_v6, %v740_v51  ;;  %v1196_v6 = vld [vmem:[%s2421_s4 + $0xb0] sm:$0xff]  ;;  %v1197_v51 = vld [vmem:[%s2421_s4 + $0xb8] sm:$0xff] }
 0x165   :  { %1728 = vmatprep.subr.bf16.mxu1 %v1727_v55  ;;  %v1757_v55 = vpack.c.bf16 %v1179_v4, %v1178_v3 }
 0x166   :  { %1730 = vmatpush3.bf16.msra.mxu1 %v2205_v16  ;;  %v989_v16 = vld [vmem:[%s2419_s3 + $0x18] sm:$0xff] }
 0x167   :  { %1654 = vmatprep.subr.mxu1 %v1785_v8  ;;  %v1731_v21 = vpack.c.bf16 %v989_v16, %v987_v13  ;;  %v1182_v13 = vld [vmem:[%s2421_s4 + $0x40] sm:$0xff]  ;;  %v1183_v16 = vld [vmem:[%s2421_s4 + $0x48] sm:$0xff] }
 0x169   :  { %1365 = vmatmul.mubr.msk.f32.vlgmr.msra.gmra.mrb[2].mxu1 %vm2114_vm13, %v1784_v14 }
 0x16a   :  { %1655 = vmatpush3.msra.mxu1 %v25_v62  ;;  %1656 = vmatprep.mubr.msk.f32.mxu1 %vm1786_vm14, %v1785_v8  ;;  %v1180_v62 = vld [vmem:[%s2421_s4 + $0x30] sm:$0xff] }
 0x16b   :  { %1367 = vmatprep.subr.msk.mxu1 %vm1009_vm15, %v2239_v17 }
 0x1fc   :  { %v1473_v32 = vpop.f32.mrb[0].mxu1 }
 0x1fd   :  { %v1474_v14 = vpop.f32.mrb[1].mxu1 }
 0x1fe   :  { %v1475_v5 = vadd.f32 %v1474_v14, %v1473_v32  ;;  %v1181_v32 = vld [vmem:[%s2421_s4 + $0x38] sm:$0xff]  ;;  %v1198_v14 = vld [vmem:[%s2421_s4 + $0xc0] sm:$0xff] }
 0x23c   :  { %v1508_v11 = vpop.f32.mrb[2].mxu1 }
 0x23d   :  { %v1509_v12 = vpop.f32.mrb[3].mxu1 }
 0x23e   :  { %v1510_v18 = vadd.f32 %v1509_v12, %v1508_v11  ;;  %v1761_v11 = vpack.c.bf16 %v1181_v32, %v1180_v62 }
 0x240   :  { %v904_v58 = vadd.f32 %v1510_v18, %v1475_v5  ;;  %v1199_v5 = vld [vmem:[%s2421_s4 + $0xc8] sm:$0xff]  ;;  %v1200_v18 = vld [vmem:[%s2421_s4 + $0xd0] sm:$0xff] }
 0x241   :  { %v1763_v12 = vpack.c.bf16 %v1199_v5, %v1198_v14 }
 0x242   :  { %1657 = vmatmul.mubr.msk.f32.vlgmr.msra.gmra.mrb[4].mxu1 %vm911_vm0, %v904_v58  ;;  %v1201_v58 = vld [vmem:[%s2421_s4 + $0xd8] sm:$0xff] }
 0x243   :  { %1368 = vmatpush1.msk.msra.mxu1 %vm1009_vm15, %v2252_v19  ;;  %1080 = vmatprep.mubr.f32.mxu1 %v1785_v8  ;;  %v1767_v22 = vpack.c.bf16 %v1201_v58, %v1200_v18  ;;  %v27_v19 = vld [vmem:[%s2417_s2 + $0x38] sm:$0xff] }
 0x244   :  { %1732 = vmatprep.subr.bf16.mxu1 %v1731_v21  ;;  %v1765_v21 = vpack.c.bf16 %v1183_v16, %v1182_v13 }
 0x246   :  { %1369 = vmatmul.mubr.msk.f32.vlgmr.msra.gmra.mrb[6].mxu1 %vm1005_vm1, %v1004_v1  ;;  %v1203_v1 = vld [vmem:[%s2421_s4 + $0xe8] sm:$0xff] }
 0x247   :  { %1734 = vmatpush1.bf16.msra.mxu1 %v1733_v26  ;;  %1155 = vmatprep.mubr.f32.mxu1 %v1785_v8  ;;  %v1759_v8 = vpack.c.bf16 %v1197_v51, %v1196_v6  ;;  %v1769_v26 = vpack.c.bf16 %v1185_v24, %v1184_v23 }
 0x248   :  { %1736 = vmatprep.subr.bf16.mxu1 %v1735_v28  ;;  %v1771_v28 = vpack.c.bf16 %v1203_v1, %v1202_v25 }
 0x24b   :  { %1738 = vmatpush1.bf16.msra.mxu1 %v1737_v34  ;;  %v1205_v34 = vld [vmem:[%s2421_s4 + $0xf8] sm:$0xff] }
 0x24c   :  { %1740 = vmatprep.subr.bf16.mxu1 %v1739_v20  ;;  %v1775_v20 = vpack.c.bf16 %v1205_v34, %v1204_v10 }
 0x24f   :  { %1742 = vmatpush1.bf16.msra.mxu1 %v1741_v39  ;;  %v1777_v39 = vpack.c.bf16 %v1189_v38, %v1188_v36 }
 0x250   :  { %1744 = vmatprep.subr.bf16.mxu1 %v1743_v15  ;;  %v1169_v15 = vrot.slane %v2239_v17, %v1164_v40 }
 0x253   :  { %1746 = vmatpush1.bf16.msra.mxu1 %v1745_v27 }
 0x254   :  { %1748 = vmatprep.subr.bf16.mxu1 %v1747_v47 }
 0x315   :  { %v981_v53 = vpop.f32.mrb[4].mxu1 }
 0x316   :  { %v982_v37 = vadd.f32 %v981_v53, %v910_v50  ;;  %v1658_v57 = vpop.f32.mrb[5].mxu1  ;;  %v1371_v50 = vld [vmem:[%s2421_s4 + $0x100] ss:$0 sm:$0xff]  ;;  %v1285_v53 = vrot.slane %v27_v19, %v909_v49 }
 0x318   :  { %v985_v59 = vmax.f32 %v982_v37, 0.0 }
 0x31a   :  { %1370 = vmatmul.mubr.msk.f32.vlgmr.msra.gmra.mrb[6].mxu1 %vm1087_vm2, %v985_v59 }
 0x31b   :  { %1750 = vmatpush3.bf16.msra.mxu1 %v1749_v42 }
 0x31c   :  { %1752 = vmatprep.subr.bf16.mxu1 %v1751_v60 }
 0x31f   :  { %1754 = vmatpush3.bf16.msra.mxu1 %v1753_v48 }
 0x320   :  { %1756 = vmatprep.subr.bf16.mxu1 %v1755_v2 }
 0x323   :  { %1758 = vmatpush3.bf16.msra.mxu1 %v1757_v55 }
 0x324   :  { %1760 = vmatprep.subr.bf16.mxu1 %v1759_v8 }
 0x327   :  { %1762 = vmatpush3.bf16.msra.mxu1 %v1761_v11 }
 0x328   :  { %1764 = vmatprep.subr.bf16.mxu1 %v1763_v12 }
 0x32b   :  { %1766 = vmatpush3.bf16.msra.mxu1 %v1765_v21 }
 0x32c   :  { %1768 = vmatprep.subr.bf16.mxu1 %v1767_v22 }
 0x32f   :  { %1770 = vmatpush3.bf16.msra.mxu1 %v1769_v26 }
 0x330   :  { %1772 = vmatprep.subr.bf16.mxu1 %v1771_v28 }
 0x333   :  { %1774 = vmatpush3.bf16.msra.mxu1 %v1773_v33 }
 0x334   :  { %1776 = vmatprep.subr.bf16.mxu1 %v1775_v20 }
 0x337   :  { %1778 = vmatpush3.bf16.msra.mxu1 %v1777_v39 }
 0x3ed   :  { %v1157_v43 = vpop.f32.mrb[6].mxu1 }
 0x3ee   :  { %v1170_v45 = vadd.f32 %v1165_v41, %v1157_v43  ;;  %v1159_v27 = vpop.f32.mrb[7].mxu1 }
 0x3ef   :  { %v1171_v46 = vadd.f32 %v1169_v15, %v1159_v27 }
 0x3f0   :  { %v1172_v47 = vmax.f32 %v1170_v45, 0.0 }
 0x3f1   :  { %v1173_v30 = vmax.f32 %v1171_v46, 0.0 }
 0x3f3   :  { %1275 = vmatprep.mubr.f32.mxu1 %v1173_v30 }
 0x3f4   :  { %1276 = vmatmul.mubr.f32.vlgmr.msra.gmra.mrb[8].mxu1 %v1172_v47 }
 0x4c7   :  { %v1545_v7 = vpop.f32.mrb[8].mxu1 }
 0x4c8   :  { %v1546_v35 = vpop.f32.mrb[9].mxu1 }
 0x4c9   :  { %v1547_v52 = vadd.f32 %v1546_v35, %v1545_v7 }
 0x4cb   :  { %v1278_v17 = vadd.f32 %v1547_v52, %v1371_v50 }
 0x4cd   :  { %v1281_v54 = vmax.f32 %v1278_v17, 0.0 }
 0x4cf   :  { %v1286_v56 = vmul.f32 %v1285_v53, %v1281_v54 }
 0x4d1   :  { %v1288_v37 = vsel %vm1287_vm3, %v1286_v56, 0.0 }
 0x4d2   :  { %1289 = vadd.xlane.f32.xlu0 %v1288_v37 }
 0x55f   :  { %v1290_v57 = vpop.xlane.xlu0 %1289 }
 0x560   :  { %1292 = vst.msk [vmem:[%s2422_s5] sm:$0x3] %vm1291_vm4, %v1290_v57 }

</bundles_post_ra>
